<compile_context>
chip_gen: v7x
topology: tpu7x:2x2x1
jax: 0.10.0
libtpu: 0.0.40
codegen_flags: <defaults>
</compile_context>

<pallas_src>
import jax
import jax.numpy as jnp
from jax.experimental import pallas as pl
from jax.experimental.pallas import tpu as pltpu

LANE = 128     # TPU lane width
H1 = 128       # hidden 1
H2 = 64        # hidden 2
IN_DIM = 2     # observation dim of the first Linear

# Parameter slab layout (rows of a (320, 128) array; every offset is a multiple of 16
# so slices stay sublane-aligned even with bf16 packing).
_ROW_W1 = 0      # rows 0..1   : w1 (2, 128)
_ROW_B1 = 16     # row  16     : b1 (1, 128)
_ROW_W2 = 32     # rows 32..159: w2 (128, 64) zero-padded to (128, 128)
_ROW_B2 = 160    # row  160    : b2 (1, 64)  zero-padded to (1, 128)
_ROW_W3 = 176    # rows 176..239: w3 (64, n_actions) zero-padded to (128, 128)
_ROW_B3 = 304    # row  304    : b3 (1, n_actions) zero-padded to (1, 128)
_SLAB_ROWS = 320


def _round_up(x, m):
    return ((x + m - 1) // m) * m


def _mlp_kernel(x_ref, p_ref, o_ref):
    f32 = jnp.float32
    pdt = p_ref.dtype

    x = x_ref[...]                                            # (TB, 2) f32

    # ---- Layer 1 on the VPU (K=2 is far too thin for the MXU) ----------------
    w1r0 = p_ref[_ROW_W1:_ROW_W1 + 1, :].astype(f32)          # (1, 128)
    w1r1 = p_ref[_ROW_W1 + 1:_ROW_W1 + 2, :].astype(f32)      # (1, 128)
    b1 = p_ref[_ROW_B1:_ROW_B1 + 1, :].astype(f32)            # (1, 128)
    h1 = x[:, 0:1] * w1r0 + x[:, 1:2] * w1r1 + b1             # (TB, 128)
    h1 = jnp.maximum(h1, 0.0)

    # ---- Layer 2 on the MXU (output columns 64..127 are zero by construction) -
    w2 = p_ref[_ROW_W2:_ROW_W2 + LANE, :]                     # (128, 128)
    b2 = p_ref[_ROW_B2:_ROW_B2 + 1, :].astype(f32)            # (1, 128)
    h2 = jnp.dot(h1.astype(pdt), w2, preferred_element_type=f32) + b2
    h2 = jnp.maximum(h2, 0.0)                                 # (TB, 128)

    # ---- Layer 3 on the MXU (padded rows/cols of w3 are zero) -----------------
    w3 = p_ref[_ROW_W3:_ROW_W3 + LANE, :]                     # (128, 128)
    b3 = p_ref[_ROW_B3:_ROW_B3 + 1, :].astype(f32)            # (1, 128)
    out = jnp.dot(h2.astype(pdt), w3, preferred_element_type=f32) + b3

    o_ref[...] = out.astype(o_ref.dtype)                      # lane-dense (TB, 128)


def _pack_params(params, n_actions, dtype):
    """Pack w1,b1,w2,b2,w3,b3 into one zero-padded, tile-aligned (320,128) slab."""
    w1, b1, w2, b2, w3, b3 = params
    assert w1.shape == (IN_DIM, H1) and w2.shape == (H1, H2)
    assert w3.shape == (H2, n_actions) and n_actions <= LANE

    slab = jnp.zeros((_SLAB_ROWS, LANE), dtype)
    slab = slab.at[_ROW_W1:_ROW_W1 + IN_DIM, :H1].set(w1.astype(dtype))
    slab = slab.at[_ROW_B1:_ROW_B1 + 1, :H1].set(b1.reshape(1, H1).astype(dtype))
    slab = slab.at[_ROW_W2:_ROW_W2 + H1, :H2].set(w2.astype(dtype))
    slab = slab.at[_ROW_B2:_ROW_B2 + 1, :H2].set(b2.reshape(1, H2).astype(dtype))
    slab = slab.at[_ROW_W3:_ROW_W3 + H2, :n_actions].set(w3.astype(dtype))
    slab = slab.at[_ROW_B3:_ROW_B3 + 1, :n_actions].set(b3.reshape(1, n_actions).astype(dtype))
    return slab


def dqn_forward(x, params, *, param_dtype=jnp.float32, block_batch=1024):
    """x: (B, 2) -> (B, n_actions) float32."""
    n_actions = params[4].shape[1]
    batch = x.shape[0]
    x = x.astype(jnp.float32)

    slab = _pack_params(params, n_actions, param_dtype)

    # Pad batch to sublane-friendly size and pick a batch tile (weight-resident grid).
    bp = _round_up(max(batch, 16), 16)
    if bp > block_batch:
        tb = block_batch
        bp = _round_up(bp, tb)
    else:
        tb = bp
    if bp != batch:
        x = jnp.pad(x, ((0, bp - batch), (0, 0)))

    grid = (bp // tb,)
    out = pl.pallas_call(
        _mlp_kernel,
        out_shape=jax.ShapeDtypeStruct((bp, LANE), jnp.float32),
        grid_spec=pltpu.PrefetchScalarGridSpec(
            num_scalar_prefetch=0,
            grid=grid,
            in_specs=[
                pl.BlockSpec((tb, IN_DIM), lambda i: (i, 0)),        # streamed activations
                pl.BlockSpec((_SLAB_ROWS, LANE), lambda i: (0, 0)),  # resident weight slab
            ],
            out_specs=pl.BlockSpec((tb, LANE), lambda i: (i, 0)),    # lane-dense output
        ),
        compiler_params=pltpu.CompilerParams(
            dimension_semantics=("parallel",),  # v7x: shard batch tiles across both TCs
        ),
    )(x, slab)
    return out[:batch, :n_actions]


def init_params(key, n_actions):
    """Deterministic synthetic init (PyTorch-like uniform fan-in scaling)."""
    def linear(k, fan_in, fan_out):
        kw, kb = jax.random.split(k)
        bound = 1.0 / jnp.sqrt(fan_in)
        w = jax.random.uniform(kw, (fan_in, fan_out), jnp.float32, -bound, bound)
        b = jax.random.uniform(kb, (1, fan_out), jnp.float32, -bound, bound)
        return w, b

    k1, k2, k3 = jax.random.split(key, 3)
    w1, b1 = linear(k1, IN_DIM, H1)
    w2, b2 = linear(k2, H1, H2)
    w3, b3 = linear(k3, H2, n_actions)
    return (w1, b1, w2, b2, w3, b3)


def reference_forward(x, params):
    w1, b1, w2, b2, w3, b3 = params
    h = jnp.maximum(x @ w1 + b1, 0.0)
    h = jnp.maximum(h @ w2 + b2, 0.0)
    return h @ w3 + b3


if __name__ == "__main__":
    key = jax.random.PRNGKey(0)
    k_params, k_x, k_xl = jax.random.split(key, 3)

    n_actions = 4
    params = init_params(k_params, n_actions)

    # Small batch (typical per-step DQN inference), f32 params.
    x = jax.random.normal(k_x, (8, 2), dtype=jnp.float32)
    out = jax.block_until_ready(dqn_forward(x, params))
    ref = reference_forward(x, params)
    assert out.shape == (8, n_actions)
    assert jnp.allclose(out, ref, atol=1e-4, rtol=1e-4)

    # Larger batch: exercises the weight-resident batch grid (grid=(4,), TB=1024).
    x_large = jax.random.normal(k_xl, (4096, 2), dtype=jnp.float32)
    out_large = jax.block_until_ready(dqn_forward(x_large, params))
    ref_large = reference_forward(x_large, params)
    assert out_large.shape == (4096, n_actions)
    assert jnp.allclose(out_large, ref_large, atol=1e-4, rtol=1e-4)

    # bf16 parameter slab (halves param DMA bytes; f32 accumulate), loose tolerance.
    out_bf16 = jax.block_until_ready(dqn_forward(x, params, param_dtype=jnp.bfloat16))
    assert jnp.allclose(out_bf16, ref, atol=1e-1, rtol=1e-1)

    print("KERNEL_OK")
</pallas_src>

<mosaic_0001>
module attributes {stable_mosaic.version = 11 : i64} {
  func.func @_mlp_kernel(%arg0: i32, %arg1: memref<16x2xf32, #tpu.memory_space<vmem>>, %arg2: memref<320x128xf32, #tpu.memory_space<vmem>>, %arg3: memref<16x128xf32, #tpu.memory_space<vmem>>) attributes {dimension_semantics = [#tpu.dimension_semantics<parallel>], iteration_bounds = array<i64: 1>, scalar_prefetch = 0 : i64, scratch_operands = 0 : i64, tpu.core_type = #tpu.core_type<tc>, window_params = [{transform_indices = @transform_0, window_bounds = array<i64: 16, 2>}, {pipeline_mode = #tpu.pipeline_mode<synchronous>, transform_indices = @transform_1, window_bounds = array<i64: 320, 128>}, {transform_indices = @transform_2, window_bounds = array<i64: 16, 128>}]} {
    %c0 = arith.constant 0 : index
    %c0_0 = arith.constant 0 : index
    %0 = vector.load %arg1[%c0, %c0_0] : memref<16x2xf32, #tpu.memory_space<vmem>>, vector<16x2xf32>
    %c0_1 = arith.constant 0 : index
    %c0_2 = arith.constant 0 : index
    %1 = vector.load %arg2[%c0_1, %c0_2] : memref<320x128xf32, #tpu.memory_space<vmem>>, vector<1x128xf32>
    %c1 = arith.constant 1 : index
    %c0_3 = arith.constant 0 : index
    %2 = vector.load %arg2[%c1, %c0_3] : memref<320x128xf32, #tpu.memory_space<vmem>>, vector<1x128xf32>
    %c16 = arith.constant 16 : index
    %c0_4 = arith.constant 0 : index
    %3 = vector.load %arg2[%c16, %c0_4] : memref<320x128xf32, #tpu.memory_space<vmem>>, vector<1x128xf32>
    %4 = vector.extract_strided_slice %0 {offsets = [0, 0], sizes = [16, 1], strides = [1, 1]} : vector<16x2xf32> to vector<16x1xf32>
    %5 = vector.broadcast %4 : vector<16x1xf32> to vector<16x128xf32>
    %6 = vector.broadcast %1 : vector<1x128xf32> to vector<16x128xf32>
    %7 = arith.mulf %5, %6 : vector<16x128xf32>
    %8 = vector.extract_strided_slice %0 {offsets = [0, 1], sizes = [16, 1], strides = [1, 1]} : vector<16x2xf32> to vector<16x1xf32>
    %9 = vector.broadcast %8 : vector<16x1xf32> to vector<16x128xf32>
    %10 = vector.broadcast %2 : vector<1x128xf32> to vector<16x128xf32>
    %11 = arith.mulf %9, %10 : vector<16x128xf32>
    %12 = arith.addf %7, %11 : vector<16x128xf32>
    %13 = vector.broadcast %3 : vector<1x128xf32> to vector<16x128xf32>
    %14 = arith.addf %12, %13 : vector<16x128xf32>
    %cst = arith.constant 0.000000e+00 : f32
    %15 = vector.broadcast %cst : f32 to vector<16x128xf32>
    %16 = arith.maximumf %14, %15 : vector<16x128xf32>
    %c32 = arith.constant 32 : index
    %c0_5 = arith.constant 0 : index
    %17 = vector.load %arg2[%c32, %c0_5] : memref<320x128xf32, #tpu.memory_space<vmem>>, vector<128x128xf32>
    %c160 = arith.constant 160 : index
    %c0_6 = arith.constant 0 : index
    %18 = vector.load %arg2[%c160, %c0_6] : memref<320x128xf32, #tpu.memory_space<vmem>>, vector<1x128xf32>
    %cst_7 = arith.constant dense<0.000000e+00> : vector<16x128xf32>
    %19 = tpu.matmul %16, %17, %cst_7 {dimension_numbers = #tpu.dot_dimension_numbers<[1], [0], [0], [1], [0, 0, 1, 1], [], []>} : vector<16x128xf32>, vector<128x128xf32>, vector<16x128xf32> -> vector<16x128xf32>
    %20 = vector.broadcast %18 : vector<1x128xf32> to vector<16x128xf32>
    %21 = arith.addf %19, %20 : vector<16x128xf32>
    %cst_8 = arith.constant 0.000000e+00 : f32
    %22 = vector.broadcast %cst_8 : f32 to vector<16x128xf32>
    %23 = arith.maximumf %21, %22 : vector<16x128xf32>
    %c176 = arith.constant 176 : index
    %c0_9 = arith.constant 0 : index
    %24 = vector.load %arg2[%c176, %c0_9] : memref<320x128xf32, #tpu.memory_space<vmem>>, vector<128x128xf32>
    %c304 = arith.constant 304 : index
    %c0_10 = arith.constant 0 : index
    %25 = vector.load %arg2[%c304, %c0_10] : memref<320x128xf32, #tpu.memory_space<vmem>>, vector<1x128xf32>
    %cst_11 = arith.constant dense<0.000000e+00> : vector<16x128xf32>
    %26 = tpu.matmul %23, %24, %cst_11 {dimension_numbers = #tpu.dot_dimension_numbers<[1], [0], [0], [1], [0, 0, 1, 1], [], []>} : vector<16x128xf32>, vector<128x128xf32>, vector<16x128xf32> -> vector<16x128xf32>
    %27 = vector.broadcast %25 : vector<1x128xf32> to vector<16x128xf32>
    %28 = arith.addf %26, %27 : vector<16x128xf32>
    %c0_12 = arith.constant 0 : index
    %c0_13 = arith.constant 0 : index
    %29 = vector.load %arg3[%c0_12, %c0_13] : memref<16x128xf32, #tpu.memory_space<vmem>>, vector<16x128xf32>
    tpu.vector_store %arg3[%c0_12, %c0_13], %28 {strides = array<i32>} : memref<16x128xf32, #tpu.memory_space<vmem>>, vector<16x128xf32>,
    return
  }
  func.func @transform_0(%arg0: i32) -> (i32, i32) {
    %c0_i32 = arith.constant 0 : i32
    %c0_i32_0 = arith.constant 0 : i32
    return %arg0, %c0_i32 : i32, i32
  }
  func.func @transform_1(%arg0: i32) -> (i32, i32) {
    %c0_i32 = arith.constant 0 : i32
    %c0_i32_0 = arith.constant 0 : i32
    %c0_i32_1 = arith.constant 0 : i32
    return %c0_i32, %c0_i32_0 : i32, i32
  }
  func.func @transform_2(%arg0: i32) -> (i32, i32) {
    %c0_i32 = arith.constant 0 : i32
    %c0_i32_0 = arith.constant 0 : i32
    return %arg0, %c0_i32 : i32, i32
  }
}

</mosaic_0001>

<bundles_post_ra>
// kernel: tpu_custom_call.1
= control target key start
LH: loop header
LB: loop body
LE: loop exit
PB: predicated region body
PF: predicated region fallthrough
CT: control target
= control target key end

     0   :  { %7 = vsyncpa [#allocation3], 0  ;;  %s574_s0 = inlined_call_operand.vmem [shape: f32[16,2], index: 0, kind: input, shape index: {}]   ;;  %s575_s1 = inlined_call_operand.hbm [shape: f32[320,128], index: 1, kind: input, shape index: {}]   ;;  %s576_s2 = inlined_call_operand.hbm [shape: f32[16,128], index: 2, kind: output, shape index: {}]  }
   0x1   :  { %8 = vsyncpa [#allocation4], 0  ;;  %s517_s9 = smov [#allocation2]   ;;  %s469_s13 = scalar_lea.hbm %s575_s1, 5120 }
   0x2   :  { %s16_s10 = sshll.u32 %s517_s9, 4  ;;  %p470_p0 = scmp.ne.s32.totalorder %s575_s1, %s469_s13  ;;  %s17_s10 = int_to_ptr.vmem [resolvable:$true] %s16_s10 }
   0x3   :  { %p473_p1 = scmp.lt.u32.totalorder %s469_s13, %s575_s1 }
   0x5   :  { %p475_p2 = pnand %p473_p1, %p470_p0 }
   0x7   :  { %478 = shalt.err (!%p475_p2)
}
   0x8   :  { %s479_s18 = scalar_lea.vmem %s17_s10, 5120  ;;  %p484_p4 = scmp.lt.s32.totalorder %s17_s10, %s17_s10 }
   0x9   :  { %p480_p3 = scmp.ne.s32.totalorder %s17_s10, %s479_s18  ;;  %p485_p5 = scmp.lt.s32.totalorder %s479_s18, %s479_s18 }
   0xb   :  { %p486_p6 = por %p485_p5, %p484_p4 }
   0xd   :  { %p487_p7 = pnand %p486_p6, %p480_p3 }
   0xf   :  { %490 = shalt.err (!%p487_p7)
}
  0x10   :  { %s518_s19 = smov 128   ;;  %s519_s20 = smov 8  }
  0x11   :  { %22 = dma.hbm_to_vmem [thread:$0]  %s575_s1, 5120, %s17_s10, [#allocation3], %s518_s19, %s518_s19, %s519_s20  }
  0x12   :  { %513 = dma.done.wait [#allocation3], 5120  }
  0x13   :  { %514 = vsyncadd [#allocation3], 4294962176  ;;  %v520_v0 = vmov 0   ;;  %v27_v1 = vld [vmem:[%s574_s0 + $0x8] sm:$0xff]  ;;  %v26_v2 = vld [vmem:[%s574_s0] sm:$0xff]  ;;  %v521_v9 = vmov 1  }
  0x14   :  { %467 = vset.pattern.permute.xlu1 %v520_v0  ;;  %465 = vset.pattern.permute.xlu0 %v520_v0  ;;  %v71_v3 = vld [vmem:[#allocation2 + $0x20] sm:$0xff]  ;;  %v72_v4 = vld [vmem:[#allocation2 + $0x28] sm:$0xff]  ;;  %v73_v5 = vld [vmem:[#allocation2 + $0x30] sm:$0xff]  ;;  %s522_s0 = smov [#allocation5]  }
  0x15   :  { %38 = vperm.xlu1 %467, %v27_v1   ;;  %33 = vperm.xlu0 %465, %v26_v2   ;;  %v74_v6 = vld [vmem:[#allocation2 + $0x38] sm:$0xff]  ;;  %v395_v7 = vpack.c.bf16 %v72_v4, %v71_v3  ;;  %v75_v10 = vld [vmem:[#allocation2 + $0x40] sm:$0xff]  ;;  %v76_v11 = vld [vmem:[#allocation2 + $0x48] sm:$0xff]  ;;  %s272_s1 = sshll.u32 %s522_s0, 4  ;;  %s273_s1 = int_to_ptr.vmem [resolvable:$true] %s272_s1 }
  0x16   :  { %v399_v8 = vpack.c.bf16 %v74_v6, %v73_v5  ;;  %v403_v12 = vpack.c.bf16 %v76_v11, %v75_v10  ;;  %v77_v13 = vld [vmem:[#allocation2 + $0x50] sm:$0xff]  ;;  %v78_v14 = vld [vmem:[#allocation2 + $0x58] sm:$0xff]  ;;  %v79_v16 = vld [vmem:[#allocation2 + $0x60] sm:$0xff]  ;;  %s491_s27 = scalar_lea.vmem %s273_s1, 256  ;;  %p496_p9 = scmp.lt.s32.totalorder %s273_s1, %s273_s1 }
  0x17   :  { %396 = vmatprep.subr.bf16.mxu0 %v395_v7  ;;  %v407_v15 = vpack.c.bf16 %v78_v14, %v77_v13  ;;  %v80_v17 = vld [vmem:[#allocation2 + $0x68] sm:$0xff]  ;;  %v169_v18 = vld [vmem:[#allocation2 + $0xb0] sm:$0xff]  ;;  %v170_v19 = vld [vmem:[#allocation2 + $0xb8] sm:$0xff]  ;;  %p492_p8 = scmp.ne.s32.totalorder %s273_s1, %s491_s27  ;;  %p497_p10 = scmp.lt.s32.totalorder %s491_s27, %s491_s27 }
  0x18   :  { %398 = vmatpush3.bf16.msra.mxu0 %v395_v7  ;;  %v171_v20 = vld [vmem:[#allocation2 + $0xc0] sm:$0xff]  ;;  %v411_v21 = vpack.c.bf16 %v80_v17, %v79_v16  ;;  %v81_v22 = vld [vmem:[#allocation2 + $0x70] sm:$0xff]  ;;  %v427_v23 = vpack.c.bf16 %v170_v19, %v169_v18  ;;  %v172_v24 = vld [vmem:[#allocation2 + $0xc8] sm:$0xff] }
  0x19   :  { %468 = vset.pattern.permute.xlu1 %v521_v9  ;;  %466 = vset.pattern.permute.xlu0 %v521_v9  ;;  %v82_v25 = vld [vmem:[#allocation2 + $0x78] sm:$0xff]  ;;  %v431_v26 = vpack.c.bf16 %v172_v24, %v171_v20  ;;  %v173_v27 = vld [vmem:[#allocation2 + $0xd0] sm:$0xff]  ;;  %v83_v30 = vld [vmem:[#allocation2 + $0x80] sm:$0xff]  ;;  %p498_p11 = por %p497_p10, %p496_p9 }
  0x1a   :  { %52 = vperm.xlu1 %468, %v27_v1   ;;  %48 = vperm.xlu0 %466, %v26_v2   ;;  %v174_v28 = vld [vmem:[#allocation2 + $0xd8] sm:$0xff]  ;;  %v415_v29 = vpack.c.bf16 %v82_v25, %v81_v22  ;;  %v84_v32 = vld [vmem:[#allocation2 + $0x88] sm:$0xff]  ;;  %v175_v33 = vld [vmem:[#allocation2 + $0xe0] sm:$0xff] }
  0x1b   :  { %400 = vmatprep.subr.bf16.mxu0 %v399_v8  ;;  %428 = vmatprep.subr.bf16.mxu1 %v427_v23  ;;  %v435_v31 = vpack.c.bf16 %v174_v28, %v173_v27  ;;  %v176_v34 = vld [vmem:[#allocation2 + $0xe8] sm:$0xff]  ;;  %v419_v35 = vpack.c.bf16 %v84_v32, %v83_v30  ;;  %v85_v36 = vld [vmem:[#allocation2 + $0x90] sm:$0xff]  ;;  %v86_v38 = vld [vmem:[#allocation2 + $0x98] sm:$0xff]  ;;  %p499_p12 = pnand %p498_p11, %p492_p8 }
  0x1c   :  { %402 = vmatpush3.bf16.msra.mxu0 %v399_v8  ;;  %430 = vmatpush3.bf16.msra.mxu1 %v427_v23  ;;  %v439_v37 = vpack.c.bf16 %v176_v34, %v175_v33  ;;  %v177_v39 = vld [vmem:[#allocation2 + $0xf0] sm:$0xff]  ;;  %v178_v40 = vld [vmem:[#allocation2 + $0xf8] sm:$0xff]  ;;  %v423_v41 = vpack.c.bf16 %v86_v38, %v85_v36  ;;  %v179_v43 = vld [vmem:[#allocation2 + $0x100] sm:$0xff] }
  0x1d   :  { %404 = vmatprep.subr.bf16.mxu0 %v403_v12  ;;  %432 = vmatprep.subr.bf16.mxu1 %v431_v26  ;;  %v443_v42 = vpack.c.bf16 %v178_v40, %v177_v39  ;;  %v180_v44 = vld [vmem:[#allocation2 + $0x108] sm:$0xff]  ;;  %v181_v46 = vld [vmem:[#allocation2 + $0x110] sm:$0xff]  ;;  %v182_v47 = vld [vmem:[#allocation2 + $0x118] sm:$0xff] }
  0x1e   :  { %v447_v45 = vpack.c.bf16 %v180_v44, %v179_v43  ;;  %v451_v48 = vpack.c.bf16 %v182_v47, %v181_v46  ;;  %v284_v51 = vld [vmem:[#allocation2] ss:$0 sm:$0xff]  ;;  %v285_v52 = vld [vmem:[#allocation2 + $0x1] ss:$0 sm:$0xff]  ;;  %v286_v59 = vld [vmem:[#allocation2 + $0x10] ss:$0 sm:$0xff] }
  0x1f   :  { %v183_v2 = vld [vmem:[#allocation2 + $0x120] sm:$0xff]  ;;  %v184_v3 = vld [vmem:[#allocation2 + $0x128] sm:$0xff] }
  0x20   :  { %406 = vmatpush3.bf16.msra.mxu0 %v403_v12  ;;  %434 = vmatpush3.bf16.msra.mxu1 %v431_v26  ;;  %v455_v4 = vpack.c.bf16 %v184_v3, %v183_v2  ;;  %v287_v5 = vld [vmem:[#allocation2 + $0xa0] ss:$0 sm:$0xff]  ;;  %v288_v12 = vld [vmem:[#allocation2 + $0x130] ss:$0 sm:$0xff] }
  0x21   :  { %408 = vmatprep.subr.bf16.mxu0 %v407_v15  ;;  %436 = vmatprep.subr.bf16.mxu1 %v435_v31 }
  0x24   :  { %410 = vmatpush3.bf16.msra.mxu0 %v407_v15  ;;  %438 = vmatpush3.bf16.msra.mxu1 %v435_v31 }
  0x25   :  { %412 = vmatprep.subr.bf16.mxu0 %v411_v21  ;;  %440 = vmatprep.subr.bf16.mxu1 %v439_v37 }
  0x28   :  { %414 = vmatpush3.bf16.msra.mxu0 %v411_v21  ;;  %442 = vmatpush3.bf16.msra.mxu1 %v439_v37 }
  0x29   :  { %416 = vmatprep.subr.bf16.mxu0 %v415_v29  ;;  %444 = vmatprep.subr.bf16.mxu1 %v443_v42 }
  0x2c   :  { %418 = vmatpush3.bf16.msra.mxu0 %v415_v29  ;;  %446 = vmatpush3.bf16.msra.mxu1 %v443_v42 }
  0x2d   :  { %420 = vmatprep.subr.bf16.mxu0 %v419_v35  ;;  %448 = vmatprep.subr.bf16.mxu1 %v447_v45 }
  0x30   :  { %422 = vmatpush3.bf16.msra.mxu0 %v419_v35  ;;  %450 = vmatpush3.bf16.msra.mxu1 %v447_v45 }
  0x31   :  { %424 = vmatprep.subr.bf16.mxu0 %v423_v41  ;;  %452 = vmatprep.subr.bf16.mxu1 %v451_v48 }
  0x34   :  { %426 = vmatpush3.bf16.msra.mxu0 %v423_v41  ;;  %454 = vmatpush3.bf16.msra.mxu1 %v451_v48 }
  0x35   :  { %456 = vmatprep.subr.bf16.mxu1 %v455_v4 }
  0x38   :  { %458 = vmatpush3.bf16.msra.mxu1 %v455_v4 }
  0x94   :  { %v34_v49 = vpop.permute.xlu0 %33  ;;  %v39_v50 = vpop.permute.xlu1 %38 }
  0x95   :  { %v45_v55 = vmul.f32 %v284_v51, %v34_v49  ;;  %v46_v56 = vmul.f32 %v284_v51, %v39_v50 }
  0x99   :  { %v53_v53 = vpop.permute.xlu1 %52  ;;  %v49_v54 = vpop.permute.xlu0 %48 }
  0x9a   :  { %v60_v57 = vmul.f32 %v285_v52, %v53_v53  ;;  %v59_v58 = vmul.f32 %v285_v52, %v49_v54 }
  0x9c   :  { %v62_v60 = vadd.f32 %v60_v57, %v46_v56  ;;  %v61_v61 = vadd.f32 %v59_v58, %v45_v55 }
  0x9e   :  { %v67_v62 = vadd.f32 %v286_v59, %v61_v61  ;;  %v68_v63 = vadd.f32 %v286_v59, %v62_v60 }
  0xa0   :  { %v69_v0 = vmax.f32 %v67_v62, 0.0  ;;  %v70_v1 = vmax.f32 %v68_v63, 0.0 }
  0xa2   :  { %357 = vmatprep.mubr.f32.mxu0 %v69_v0 }
  0xa3   :  { %358 = vmatmul.mubr.f32.vlgmr.msra.gmra.mrb[0].mxu0 %v70_v1 }
 0x176   :  { %v359_v6 = vpop.f32.mrb[0].mxu0 }
 0x177   :  { %v164_v7 = vadd.f32 %v359_v6, %v287_v5  ;;  %v158_v8 = vpop.f32.mrb[1].mxu0 }
 0x178   :  { %v159_v9 = vadd.f32 %v287_v5, %v158_v8 }
 0x179   :  { %v168_v11 = vmax.f32 %v164_v7, 0.0 }
 0x17a   :  { %v167_v10 = vmax.f32 %v159_v9, 0.0 }
 0x17c   :  { %392 = vmatprep.mubr.f32.mxu1 %v167_v10 }
 0x17d   :  { %393 = vmatmul.mubr.f32.vlgmr.msra.gmra.mrb[0].mxu1 %v168_v11 }
 0x250   :  { %v394_v13 = vpop.f32.mrb[0].mxu1 }
 0x251   :  { %v262_v14 = vadd.f32 %v394_v13, %v288_v12  ;;  %v256_v15 = vpop.f32.mrb[1].mxu1 }
 0x252   :  { %v257_v16 = vadd.f32 %v288_v12, %v256_v15 }
 0x253   :  { %266 = vst [vmem:[#allocation5 + $0x8] sm:$0xff] %v262_v14 }
 0x254   :  { %265 = vst [vmem:[#allocation5] sm:$0xff] %v257_v16 }
 0x255   :  { %502 = shalt.err (!%p499_p12)
}
 0x256   :  { %s503_s30 = scalar_lea.hbm %s576_s2, 256 }
 0x257   :  { %p504_p13 = scmp.ne.s32.totalorder %s576_s2, %s503_s30  ;;  %p507_p0 = scmp.lt.u32.totalorder %s503_s30, %s576_s2 }
 0x259   :  { %p509_p1 = pnand %p507_p0, %p504_p13 }
 0x25b   :  { %512 = shalt.err (!%p509_p1)
}
 0x25c   :  { %278 = dma.vmem_to_hbm [thread:$0]  %s273_s1, 256, %s576_s2, [#allocation4], %s518_s19, %s518_s19, %s519_s20  }
 0x25d   :  { %515 = dma.done.wait [#allocation4], 256  }
 0x25e   :  { %516 = vsyncadd [#allocation4], 4294967040 }
 0x25f   :  { %282 = vsyncpa [#allocation3], 1 }
 0x260   :  { %283 = vsyncpa [#allocation4], 1 }

</bundles_post_ra>
